<compile_context>
chip_gen: v6e
topology: v6e:2x2x1
jax: 0.10.0
libtpu: 0.0.40
codegen_flags: <defaults>
</compile_context>

<pallas_src>
import jax
import jax.numpy as jnp
from jax import lax
from jax.experimental import pallas as pl
from jax.experimental.pallas import tpu as pltpu

_LANE = 128


def _round_up(x: int, m: int) -> int:
    return ((x + m - 1) // m) * m


def _pad2d(arr, shape):
    pads = [(0, t - s) for s, t in zip(arr.shape, shape)]
    return jnp.pad(arr, pads)


def _pick_tile_n(n: int, requested: int) -> int:
    """Adaptive row tile: amortize per-step overhead, don't overshoot small N,
    and keep >= 2 grid steps when N > 128 so both v7x TensorCores get work."""
    n_up = _round_up(n, _LANE)
    t = max(_LANE, min(requested, n_up))
    if n > _LANE:
        half = _round_up((n + 1) // 2, _LANE)
        t = min(t, half)
    return t


# ----------------------------------------------------------------------------
# Pallas kernel: fused (Linear -> ReLU) * enc_nb_layers -> Linear(., 1)
# ----------------------------------------------------------------------------
def _make_critic_kernel(n_enc_layers: int):
    def kernel(x_ref, *refs):
        # refs layout: w0, b0, ..., w_{L-1}, b_{L-1}, wf_row, bf(SMEM), out_ref
        out_ref = refs[-1]
        params = refs[:-1]

        h = x_ref[...]                                   # f32 (tile_n, D)
        for i in range(n_enc_layers):
            w = params[2 * i][...]                       # f32 (in, hid_pad)
            b = params[2 * i + 1][...]                   # f32 (1, hid_pad)
            h = jnp.maximum(
                jnp.dot(h, w, preferred_element_type=jnp.float32) + b, 0.0)

        wf = params[2 * n_enc_layers][...]               # f32 (1, hid_pad)
        bf = params[2 * n_enc_layers + 1][0]             # f32 scalar from SMEM
        # trans_b matmul: (1, hid) x (tile_n, hid)^T -> (1, tile_n), lane-dense.
        val = lax.dot_general(
            wf, h,
            dimension_numbers=(((1,), (1,)), ((), ())),
            preferred_element_type=jnp.float32)
        out_ref[...] = (val + bf).astype(out_ref.dtype)

    return kernel


# ----------------------------------------------------------------------------
# Reference / small-N path (plain jnp, full f32 — matches the PyTorch module)
# ----------------------------------------------------------------------------
def _mlp_reference(x, enc_weights, enc_biases, final_w, final_b):
    h = x
    for w, b in zip(enc_weights, enc_biases):
        h = jnp.maximum(
            jnp.dot(h, w, precision=lax.Precision.HIGHEST) + b[None, :], 0.0)
    v = jnp.dot(h, final_w, precision=lax.Precision.HIGHEST) + final_b[None, :]
    return jnp.squeeze(v, axis=1)


# ----------------------------------------------------------------------------
# Wrapper
# ----------------------------------------------------------------------------
def gaqn_critic_forward(x, enc_weights, enc_biases, final_w, final_b,
                        *, tile_n=1024, min_pallas_n=64):
    """Pallas implementation of GAQN_Critic.forward on the embedding X.

    Args:
      x:           (N, D) float32 candidate embeddings.
      enc_weights: list of (in_i, hid_i) float32 weights.
      enc_biases:  list of (hid_i,) float32 biases.
      final_w:     (hid_last, 1) float32.
      final_b:     (1,) float32.
    Returns:
      (N,) float32 values (matches .squeeze(1) of the PyTorch module).
    """
    n, d = x.shape
    n_enc = len(enc_weights)

    # Tiny candidate sets: kernel launch + one grid step overhead dominates
    # the sub-microsecond compute -> plain jnp path.
    if n < min_pallas_n:
        return _mlp_reference(x, enc_weights, enc_biases, final_w, final_b)

    tn = _pick_tile_n(n, tile_n)
    num_tiles = pl.cdiv(n, tn)
    n_pad = num_tiles * tn

    # Weights/biases: pad output (lane) dims to 128; zero bias lanes + ReLU(0)=0
    # keep padded lanes inert through the stack.  X itself is NOT padded/cast.
    flat_params = []
    in_dim = d
    for w, b in zip(enc_weights, enc_biases):
        fan_in, fan_out = w.shape
        out_pad = _round_up(fan_out, _LANE)
        flat_params.append(_pad2d(w.astype(jnp.float32), (in_dim, out_pad)))
        flat_params.append(
            _pad2d(jnp.reshape(b, (1, fan_out)).astype(jnp.float32), (1, out_pad)))
        in_dim = out_pad
    # Final (hid, 1) head stored as a (1, hid_pad) row for a trans_b matmul.
    wf_row = _pad2d(jnp.reshape(final_w, (1, -1)).astype(jnp.float32), (1, in_dim))
    flat_params.append(wf_row)
    bf = jnp.reshape(final_b, (1,)).astype(jnp.float32)   # scalar -> SMEM

    # Specs: X tiled over N (last dim = full array dim D, no lane padding);
    # params resident via constant index maps; lane-dense (1, tile_n) output.
    x_spec = pl.BlockSpec((tn, d), lambda i: (i, 0))
    param_specs = [pl.BlockSpec(p.shape, lambda i: (0, 0)) for p in flat_params]
    bf_spec = pl.BlockSpec(memory_space=pltpu.MemorySpace.SMEM)
    out_spec = pl.BlockSpec((1, tn), lambda i: (0, i))

    # Advisory cost estimate for XLA's scheduler.
    flops = 0
    prev = d
    for i in range(n_enc):
        hid = flat_params[2 * i].shape[1]
        flops += 2 * prev * hid
        prev = hid
    flops += 2 * prev                         # value head, per row
    flops *= n_pad
    bytes_accessed = (int(x.size) * x.dtype.itemsize
                      + sum(int(p.size) * p.dtype.itemsize for p in flat_params)
                      + int(bf.size) * 4 + n_pad * 4)
    cost = pl.CostEstimate(flops=int(flops), transcendentals=0,
                           bytes_accessed=int(bytes_accessed))

    out = pl.pallas_call(
        _make_critic_kernel(n_enc),
        grid=(num_tiles,),
        in_specs=[x_spec] + param_specs + [bf_spec],
        out_specs=out_spec,
        out_shape=jax.ShapeDtypeStruct((1, n_pad), jnp.float32),
        compiler_params=pltpu.CompilerParams(
            dimension_semantics=("parallel",)),
        cost_estimate=cost,
    )(x.astype(jnp.float32), *flat_params, bf)

    return out[0, :n]  # .squeeze(1) of the PyTorch module; drops padded lanes


# ----------------------------------------------------------------------------
# Deterministic parameter init (mimics torch.nn.Linear default init)
# ----------------------------------------------------------------------------
def _init_linear(key, fan_in, fan_out):
    kw, kb = jax.random.split(key)
    bound = 1.0 / jnp.sqrt(jnp.float32(fan_in))
    w = jax.random.uniform(kw, (fan_in, fan_out), jnp.float32, -bound, bound)
    b = jax.random.uniform(kb, (fan_out,), jnp.float32, -bound, bound)
    return w, b


if __name__ == "__main__":
    # Shapes consistent with the module:
    #   gnn_nb_hidden[-1] = 32 -> embedding dim D = 32
    #   enc_nb_layers = 2, enc_nb_hidden = 32
    D = 32
    enc_nb_hidden = [32, 32]

    key = jax.random.PRNGKey(0)

    enc_weights, enc_biases = [], []
    in_dim = D
    for h in enc_nb_hidden:
        key, kl = jax.random.split(key)
        w, b = _init_linear(kl, in_dim, h)
        enc_weights.append(w)
        enc_biases.append(b)
        in_dim = h
    key, kf = jax.random.split(key)
    final_w, final_b = _init_linear(kf, in_dim, 1)

    # Case 1: Pallas path.  N=384 -> adaptive tile_n=256, 2 grid steps (both
    # v7x TensorCores busy) and a partially out-of-bounds final tile whose
    # padded lanes are discarded by the [:N] slice.
    N = 384
    key, kx = jax.random.split(key)
    x = jax.random.normal(kx, (N, D), jnp.float32)
    values = jax.block_until_ready(
        gaqn_critic_forward(x, enc_weights, enc_biases, final_w, final_b))
    ref = _mlp_reference(x, enc_weights, enc_biases, final_w, final_b)
    assert values.shape == (N,)
    assert jnp.allclose(values, ref, atol=5e-3, rtol=5e-3), (values, ref)

    # Case 2: tiny candidate set (N=8) takes the jnp fallback path where the
    # pallas_call launch overhead would dominate by >10x.
    key, kx2 = jax.random.split(key)
    x_small = jax.random.normal(kx2, (8, D), jnp.float32)
    v_small = jax.block_until_ready(
        gaqn_critic_forward(x_small, enc_weights, enc_biases, final_w, final_b))
    ref_small = _mlp_reference(x_small, enc_weights, enc_biases, final_w, final_b)
    assert v_small.shape == (8,)
    assert jnp.allclose(v_small, ref_small, atol=5e-3, rtol=5e-3)

    print("KERNEL_OK")
</pallas_src>

<mosaic_0001>
module attributes {stable_mosaic.version = 11 : i64} {
  func.func @kernel(%arg0: i32, %arg1: memref<256x32xf32, #tpu.memory_space<vmem>>, %arg2: memref<32x128xf32, #tpu.memory_space<vmem>>, %arg3: memref<1x128xf32, #tpu.memory_space<vmem>>, %arg4: memref<128x128xf32, #tpu.memory_space<vmem>>, %arg5: memref<1x128xf32, #tpu.memory_space<vmem>>, %arg6: memref<1x128xf32, #tpu.memory_space<vmem>>, %arg7: memref<1xf32, #tpu.memory_space<smem>>, %arg8: memref<1x256xf32, #tpu.memory_space<vmem>>) attributes {dimension_semantics = [#tpu.dimension_semantics<parallel>], iteration_bounds = array<i64: 2>, scalar_prefetch = 0 : i64, scratch_operands = 0 : i64, tpu.core_type = #tpu.core_type<tc>, window_params = [{transform_indices = @transform_0, window_bounds = array<i64: 256, 32>}, {pipeline_mode = #tpu.pipeline_mode<synchronous>, transform_indices = @transform_1, window_bounds = array<i64: 32, 128>}, {pipeline_mode = #tpu.pipeline_mode<synchronous>, transform_indices = @transform_2, window_bounds = array<i64: 1, 128>}, {pipeline_mode = #tpu.pipeline_mode<synchronous>, transform_indices = @transform_3, window_bounds = array<i64: 128, 128>}, {pipeline_mode = #tpu.pipeline_mode<synchronous>, transform_indices = @transform_4, window_bounds = array<i64: 1, 128>}, {pipeline_mode = #tpu.pipeline_mode<synchronous>, transform_indices = @transform_5, window_bounds = array<i64: 1, 128>}, {transform_indices = @transform_6, window_bounds = array<i64: 1>}, {transform_indices = @transform_7, window_bounds = array<i64: 1, 256>}]} {
    %c0 = arith.constant 0 : index
    %c0_0 = arith.constant 0 : index
    %0 = vector.load %arg1[%c0, %c0_0] : memref<256x32xf32, #tpu.memory_space<vmem>>, vector<256x32xf32>
    %c0_1 = arith.constant 0 : index
    %c0_2 = arith.constant 0 : index
    %1 = vector.load %arg2[%c0_1, %c0_2] : memref<32x128xf32, #tpu.memory_space<vmem>>, vector<32x128xf32>
    %c0_3 = arith.constant 0 : index
    %c0_4 = arith.constant 0 : index
    %2 = vector.load %arg3[%c0_3, %c0_4] : memref<1x128xf32, #tpu.memory_space<vmem>>, vector<1x128xf32>
    %cst = arith.constant dense<0.000000e+00> : vector<256x128xf32>
    %3 = tpu.matmul %0, %1, %cst {dimension_numbers = #tpu.dot_dimension_numbers<[1], [0], [0], [1], [0, 0, 1, 1], [], []>} : vector<256x32xf32>, vector<32x128xf32>, vector<256x128xf32> -> vector<256x128xf32>
    %4 = vector.broadcast %2 : vector<1x128xf32> to vector<256x128xf32>
    %5 = arith.addf %3, %4 : vector<256x128xf32>
    %cst_5 = arith.constant 0.000000e+00 : f32
    %6 = vector.broadcast %cst_5 : f32 to vector<256x128xf32>
    %7 = arith.maximumf %5, %6 : vector<256x128xf32>
    %c0_6 = arith.constant 0 : index
    %c0_7 = arith.constant 0 : index
    %8 = vector.load %arg4[%c0_6, %c0_7] : memref<128x128xf32, #tpu.memory_space<vmem>>, vector<128x128xf32>
    %c0_8 = arith.constant 0 : index
    %c0_9 = arith.constant 0 : index
    %9 = vector.load %arg5[%c0_8, %c0_9] : memref<1x128xf32, #tpu.memory_space<vmem>>, vector<1x128xf32>
    %cst_10 = arith.constant dense<0.000000e+00> : vector<256x128xf32>
    %10 = tpu.matmul %7, %8, %cst_10 {dimension_numbers = #tpu.dot_dimension_numbers<[1], [0], [0], [1], [0, 0, 1, 1], [], []>} : vector<256x128xf32>, vector<128x128xf32>, vector<256x128xf32> -> vector<256x128xf32>
    %11 = vector.broadcast %9 : vector<1x128xf32> to vector<256x128xf32>
    %12 = arith.addf %10, %11 : vector<256x128xf32>
    %cst_11 = arith.constant 0.000000e+00 : f32
    %13 = vector.broadcast %cst_11 : f32 to vector<256x128xf32>
    %14 = arith.maximumf %12, %13 : vector<256x128xf32>
    %c0_12 = arith.constant 0 : index
    %c0_13 = arith.constant 0 : index
    %15 = vector.load %arg6[%c0_12, %c0_13] : memref<1x128xf32, #tpu.memory_space<vmem>>, vector<1x128xf32>
    %c0_14 = arith.constant 0 : index
    %16 = memref.load %arg7[%c0_14] : memref<1xf32, #tpu.memory_space<smem>>
    %cst_15 = arith.constant dense<0.000000e+00> : vector<1x256xf32>
    %17 = tpu.matmul %15, %14, %cst_15 {dimension_numbers = #tpu.dot_dimension_numbers<[1], [1], [0], [0], [0, 0, 1, 0], [], []>} : vector<1x128xf32>, vector<256x128xf32>, vector<1x256xf32> -> vector<1x256xf32>
    %18 = vector.broadcast %16 : f32 to vector<1x256xf32>
    %19 = arith.addf %17, %18 : vector<1x256xf32>
    %c0_16 = arith.constant 0 : index
    %c0_17 = arith.constant 0 : index
    %20 = vector.load %arg8[%c0_16, %c0_17] : memref<1x256xf32, #tpu.memory_space<vmem>>, vector<1x256xf32>
    tpu.vector_store %arg8[%c0_16, %c0_17], %19 {strides = array<i32>} : memref<1x256xf32, #tpu.memory_space<vmem>>, vector<1x256xf32>,
    return
  }
  func.func @transform_0(%arg0: i32) -> (i32, i32) {
    %c0_i32 = arith.constant 0 : i32
    %c0_i32_0 = arith.constant 0 : i32
    return %arg0, %c0_i32 : i32, i32
  }
  func.func @transform_1(%arg0: i32) -> (i32, i32) {
    %c0_i32 = arith.constant 0 : i32
    %c0_i32_0 = arith.constant 0 : i32
    %c0_i32_1 = arith.constant 0 : i32
    return %c0_i32, %c0_i32_0 : i32, i32
  }
  func.func @transform_2(%arg0: i32) -> (i32, i32) {
    %c0_i32 = arith.constant 0 : i32
    %c0_i32_0 = arith.constant 0 : i32
    %c0_i32_1 = arith.constant 0 : i32
    return %c0_i32, %c0_i32_0 : i32, i32
  }
  func.func @transform_3(%arg0: i32) -> (i32, i32) {
    %c0_i32 = arith.constant 0 : i32
    %c0_i32_0 = arith.constant 0 : i32
    %c0_i32_1 = arith.constant 0 : i32
    return %c0_i32, %c0_i32_0 : i32, i32
  }
  func.func @transform_4(%arg0: i32) -> (i32, i32) {
    %c0_i32 = arith.constant 0 : i32
    %c0_i32_0 = arith.constant 0 : i32
    %c0_i32_1 = arith.constant 0 : i32
    return %c0_i32, %c0_i32_0 : i32, i32
  }
  func.func @transform_5(%arg0: i32) -> (i32, i32) {
    %c0_i32 = arith.constant 0 : i32
    %c0_i32_0 = arith.constant 0 : i32
    %c0_i32_1 = arith.constant 0 : i32
    return %c0_i32, %c0_i32_0 : i32, i32
  }
  func.func @transform_6(%arg0: i32) -> i32 {
    %c0_i32 = arith.constant 0 : i32
    %c0_i32_0 = arith.constant 0 : i32
    return %c0_i32 : i32
  }
  func.func @transform_7(%arg0: i32) -> (i32, i32) {
    %c0_i32 = arith.constant 0 : i32
    %c0_i32_0 = arith.constant 0 : i32
    return %c0_i32, %arg0 : i32, i32
  }
}

</mosaic_0001>

<bundles_post_ra>
// kernel: tpu_custom_call.1
= control target key start
LH: loop header
LB: loop body
LE: loop exit
PB: predicated region body
PF: predicated region fallthrough
CT: control target
= control target key end

     0   :  { %s1935_s0 = inlined_call_operand.vmem [shape: f32[384,32], index: 0, kind: input, shape index: {}]   ;;  %s1936_s1 = inlined_call_operand.vmem [shape: f32[32,128], index: 1, kind: input, shape index: {}]   ;;  %s1937_s2 = inlined_call_operand.vmem [shape: f32[1,128], index: 2, kind: input, shape index: {}]   ;;  %s1938_s3 = inlined_call_operand.vmem [shape: f32[128,128], index: 3, kind: input, shape index: {}]   ;;  %s1939_s4 = inlined_call_operand.vmem [shape: f32[1,128], index: 4, kind: input, shape index: {}]   ;;  %s1940_s5 = inlined_call_operand.vmem [shape: f32[1,128], index: 5, kind: input, shape index: {}]   ;;  %s1941_s6 = inlined_call_operand.<no memory space> [shape: f32[1], index: 6, kind: input, shape index: {}]   ;;  %s1942_s7 = inlined_call_operand.hbm [shape: f32[1,512], index: 7, kind: output, shape index: {}]  }
   0x1   :  { %12 = sst [smem:[#allocation2]] %s1941_s6 }
   0x2   :  { %13 = vsyncpa [#allocation4], 0 }
   0x3   :  { %15 = vsyncpa [#allocation4 + $0x1], 0  ;;  %s1597_s26 = smov 0   ;;  %s1599_s27 = smov 0  }
   0x4   :  { %s1601_s28 = smov 0   ;;  %s1603_s29 = smov 0  }
   0x5 LB: > { %s1148_s6 = sadd.s32 4294967295, %s1550_s29   ;;  %s1149_s30 = sadd.s32 4294967294, %s1550_s29   ;;  %s1550_s29 = sphi %s1603_s29, %s1948_s29   ;;  %s1546_s28 = sphi %s1601_s28, %s1947_s28   ;;  %s1542_s27 = sphi %s1599_s27, %s1946_s27   ;;  %s1538_s26 = sphi %s1597_s26, %s1945_s26  }
   0x6   : > { %s1620_s8 = sadd.s32 1, %s1550_s29   ;;  %s180_s9 = sadd.s32 1, %s1546_s28 }
   0x7   : > { %s177_s10 = ssub.s32 %s1550_s29, %s1620_s8  ;;  %p190_p0 = scmp.ne.s32.totalorder %s1546_s28, %s1542_s27 }
   0x8   : > { %p178_p1 = scmp.eq.s32.totalorder %s177_s10, 0  ;;  %p191_p2 = scmp.eq.s32.totalorder %s1148_s6, 1 }
   0x9   : > { %p196_p3 = scmp.ne.s32.totalorder %s1542_s27, %s1538_s26  ;;  %p197_p4 = scmp.eq.s32.totalorder %s1149_s30, 1 }
   0xa   : > { %s1630_s11 = scalar_select %p178_p1, %s1546_s28, %s180_s9  }
   0xb   : > { %p1632_p5 = por %p191_p2, %p190_p0  ;;  %p1636_p6 = por %p197_p4, %p196_p3 }
   0xc   : > { %p1152_p7 = scmp.ge.s32.totalorder %s1550_s29, 1  ;;  %p250_p8 = scmp.lt.s32.totalorder %s1550_s29, 3 }
   0xe   : > { %p251_p9 = pnand %p1152_p7, %p250_p8 }
   0xf   : > { %s1648_s18 = sshll.u32 (!%p251_p9), %s1148_s6, 5  ;;  %s979_s22 = sld [smem:[#allocation2]] (!%p251_p9) }
  0x10   : > { %254 = sbr.rel (%p251_p9) target bundleno = 767 (0x2ff), region = 48  ;;  %p291_p10 = scmp.lt.s32.totalorder (!%p251_p9), %s1648_s18, 47 }
  0x11   : > { %s283_s23 = sand.u32 (!%p251_p9), 1, %s1542_s27   ;;  %s1553_s15 = smov (!%p251_p9), [#allocation3]  }
  0x12   : > { %s1153_s24 = sshll.u32 (!%p251_p9), %s283_s23, 1  ;;  %s1076_s10 = scalar_lea.sflag (!%p251_p9), [#allocation4], %s283_s23 }
  0x13   : > { %s1494_s16 = sshll.u32 (!%p251_p9), %s1553_s15, 4  ;;  %s1495_s16 = int_to_ptr.vmem [resolvable:$false] %s1494_s16 }
  0x14   : > { %s1496_s19 = scalar_lea.vmem (!%p251_p9), %s1495_s16, 64 }
  0x15   : > { %v336_v0 = vld [vmem:[%s1936_s1 + $0x18] sm:$0xff]  ;;  %v335_v1 = vld [vmem:[%s1936_s1 + $0x10] sm:$0xff]  ;;  %v334_v4 = vld [vmem:[%s1936_s1 + $0x8] sm:$0xff]  ;;  %s292_s25 = scalar_select %p291_p10, %s1648_s18, 47  ;;  %vm344_vm0 = vcmask 261120  }
  0x16   : > { %1314 = vmatprep.subr.mxu0 %v336_v0  ;;  %v713_v2 = vld [vmem:[%s1938_s3 + $0x78] sm:$0xff]  ;;  %v712_v3 = vld [vmem:[%s1938_s3 + $0x70] sm:$0xff]  ;;  %v711_v5 = vld [vmem:[%s1938_s3 + $0x68] sm:$0xff] }
  0x17   : > { %1315 = vmatpush3.msra.mxu0 %v336_v0  ;;  %1370 = vmatprep.subr.mxu1 %v713_v2  ;;  %v333_v6 = vld [vmem:[%s1936_s1] sm:$0xff]  ;;  %s1155_s14 = sshll.u32 %s292_s25, 3  ;;  %v709_v11 = vld [vmem:[%s1938_s3 + $0x58] sm:$0xff]  ;;  %v708_v13 = vld [vmem:[%s1938_s3 + $0x50] sm:$0xff]  ;;  %s285_s25 = scalar_lea.vmem [#allocation3], %s1153_s24 }
  0x18   : > { %1316 = vmatprep.subr.mxu0 %v335_v1  ;;  %1371 = vmatpush3.msra.mxu1 %v713_v2  ;;  %s1670_s17 = scalar_lea.vmem %s1935_s0, %s1155_s14  ;;  %v710_v7 = vld [vmem:[%s1938_s3 + $0x60] sm:$0xff]  ;;  %v707_v15 = vld [vmem:[%s1938_s3 + $0x48] sm:$0xff]  ;;  %v705_v19 = vld [vmem:[%s1938_s3 + $0x38] sm:$0xff]  ;;  %s1090_s6 = sshll.u32 %s285_s25, 4  ;;  %s1091_s6 = int_to_ptr.vmem [resolvable:$true] %s1090_s6 }
  0x19   : > { %1317 = vmatpush3.msra.mxu0 %v335_v1  ;;  %1372 = vmatprep.subr.mxu1 %v712_v3  ;;  %v301_v8 = vld [vmem:[%s1670_s17] sm:$0xff]  ;;  %v302_v9 = vld [vmem:[%s1670_s17 + $0x8] sm:$0xff]  ;;  %v303_v10 = vld [vmem:[%s1670_s17 + $0x10] sm:$0xff]  ;;  %s1490_s14 = scalar_lea.vmem %s1091_s6, 32  ;;  %p1497_p0 = scmp.lt.s32.totalorder %s1091_s6, %s1495_s16 }
  0x1a   : > { %1318 = vmatprep.subr.mxu0 %v334_v4  ;;  %1373 = vmatpush3.msra.mxu1 %v712_v3  ;;  %v304_v12 = vld [vmem:[%s1670_s17 + $0x18] sm:$0xff]  ;;  %v305_v14 = vld [vmem:[%s1670_s17 + $0x20] sm:$0xff]  ;;  %v306_v16 = vld [vmem:[%s1670_s17 + $0x28] sm:$0xff]  ;;  %p1491_p11 = scmp.ne.s32.totalorder %s1091_s6, %s1490_s14  ;;  %p1498_p1 = scmp.lt.s32.totalorder %s1496_s19, %s1490_s14 }
  0x1b   : > { %1319 = vmatpush3.msra.mxu0 %v334_v4  ;;  %1374 = vmatprep.subr.mxu1 %v711_v5  ;;  %v706_v17 = vld [vmem:[%s1938_s3 + $0x40] sm:$0xff]  ;;  %v307_v18 = vld [vmem:[%s1670_s17 + $0x30] sm:$0xff]  ;;  %v308_v20 = vld [vmem:[%s1670_s17 + $0x38] sm:$0xff] }
  0x1c   : > { %1320 = vmatprep.subr.mxu0 %v333_v6  ;;  %1375 = vmatpush3.msra.mxu1 %v711_v5  ;;  %v704_v21 = vld [vmem:[%s1938_s3 + $0x30] sm:$0xff]  ;;  %v309_v22 = vld [vmem:[%s1670_s17 + $0x40] sm:$0xff]  ;;  %v703_v23 = vld [vmem:[%s1938_s3 + $0x28] sm:$0xff]  ;;  %p1492_p12 = pnand %p1491_p11, %p1632_p5  ;;  %p1499_p2 = por %p1498_p1, %p1497_p0 }
  0x1d   : > { %1321 = vmatpush3.msra.mxu0 %v333_v6  ;;  %1322 = vmatprep.mubr.msk.f32.mxu0 %vm344_vm0, %v301_v8  ;;  %v310_v24 = vld [vmem:[%s1670_s17 + $0x48] sm:$0xff]  ;;  %v702_v25 = vld [vmem:[%s1938_s3 + $0x20] sm:$0xff]  ;;  %v311_v26 = vld [vmem:[%s1670_s17 + $0x50] sm:$0xff] }
  0x1e   : > { %1323 = vmatmul.mubr.msk.f32.vlgmr.msra.gmra.mxu0 %vm344_vm0, %v302_v9  ;;  %1376 = vmatprep.subr.mxu1 %v710_v7  ;;  %v312_v27 = vld [vmem:[%s1670_s17 + $0x58] sm:$0xff]  ;;  %v313_v28 = vld [vmem:[%s1670_s17 + $0x60] sm:$0xff]  ;;  %v314_v29 = vld [vmem:[%s1670_s17 + $0x68] sm:$0xff]  ;;  %p1493_p13 = pneg %p1492_p12 }
  0x1f   : > { %1325 = vmatprep.mubr.msk.f32.mxu0 %vm344_vm0, %v303_v10  ;;  %1377 = vmatpush3.msra.mxu1 %v710_v7  ;;  %v315_v30 = vld [vmem:[%s1670_s17 + $0x70] sm:$0xff]  ;;  %v316_v31 = vld [vmem:[%s1670_s17 + $0x78] sm:$0xff]  ;;  %v317_v32 = vld [vmem:[%s1670_s17 + $0x80] sm:$0xff] }
  0x20   : > { %1378 = vmatprep.subr.mxu1 %v709_v11  ;;  %v318_v33 = vld [vmem:[%s1670_s17 + $0x88] sm:$0xff]  ;;  %v319_v34 = vld [vmem:[%s1670_s17 + $0x90] sm:$0xff]  ;;  %v320_v35 = vld [vmem:[%s1670_s17 + $0x98] sm:$0xff]  ;;  %p1500_p3 = pnand %p1499_p2, %p1493_p13 }
  0x21   : > { %1379 = vmatpush3.msra.mxu1 %v709_v11  ;;  %v321_v36 = vld [vmem:[%s1670_s17 + $0xa0] sm:$0xff]  ;;  %v322_v37 = vld [vmem:[%s1670_s17 + $0xa8] sm:$0xff]  ;;  %v323_v38 = vld [vmem:[%s1670_s17 + $0xb0] sm:$0xff] }
  0x22   : > { %1326 = vmatmul.mubr.msk.f32.gmra.mxu0 %vm344_vm0, %v304_v12  ;;  %1380 = vmatprep.subr.mxu1 %v708_v13  ;;  %v324_v39 = vld [vmem:[%s1670_s17 + $0xb8] sm:$0xff]  ;;  %v325_v40 = vld [vmem:[%s1670_s17 + $0xc0] sm:$0xff]  ;;  %v326_v41 = vld [vmem:[%s1670_s17 + $0xc8] sm:$0xff] }
  0x23   : > { %1328 = vmatprep.mubr.msk.f32.mxu0 %vm344_vm0, %v305_v14  ;;  %1381 = vmatpush3.msra.mxu1 %v708_v13  ;;  %v327_v42 = vld [vmem:[%s1670_s17 + $0xd0] sm:$0xff]  ;;  %v328_v43 = vld [vmem:[%s1670_s17 + $0xd8] sm:$0xff]  ;;  %v329_v44 = vld [vmem:[%s1670_s17 + $0xe0] sm:$0xff] }
  0x24   : > { %1382 = vmatprep.subr.mxu1 %v707_v15  ;;  %v330_v45 = vld [vmem:[%s1670_s17 + $0xe8] sm:$0xff]  ;;  %v331_v46 = vld [vmem:[%s1670_s17 + $0xf0] sm:$0xff]  ;;  %v332_v47 = vld [vmem:[%s1670_s17 + $0xf8] sm:$0xff]  ;;  %s1088_s17 = scalar_lea.hbm %s1942_s7, %s1648_s18 }
  0x25   : > { %1383 = vmatpush3.msra.mxu1 %v707_v15  ;;  %v701_v48 = vld [vmem:[%s1938_s3 + $0x18] sm:$0xff]  ;;  %v700_v49 = vld [vmem:[%s1938_s3 + $0x10] sm:$0xff]  ;;  %v699_v50 = vld [vmem:[%s1938_s3 + $0x8] sm:$0xff] }
  0x26   : > { %1329 = vmatmul.mubr.msk.f32.gmra.mxu0 %vm344_vm0, %v306_v16  ;;  %1384 = vmatprep.subr.mxu1 %v706_v17  ;;  %v698_v51 = vld [vmem:[%s1938_s3] sm:$0xff] }
  0x27   : > { %1331 = vmatprep.mubr.msk.f32.mxu0 %vm344_vm0, %v307_v18  ;;  %1385 = vmatpush3.msra.mxu1 %v706_v17  ;;  %v1778_v52 = vld [vmem:[%s1937_s2] ss:$0 sm:$0xff] }
  0x28   : > { %1386 = vmatprep.subr.mxu1 %v705_v19 }
  0x29   : > { %1387 = vmatpush3.msra.mxu1 %v705_v19 }
  0x2a   : > { %1332 = vmatmul.mubr.msk.f32.gmra.mxu0 %vm344_vm0, %v308_v20  ;;  %1388 = vmatprep.subr.mxu1 %v704_v21 }
  0x2b   : > { %1334 = vmatprep.mubr.msk.f32.mxu0 %vm344_vm0, %v309_v22  ;;  %1389 = vmatpush3.msra.mxu1 %v704_v21 }
  0x2c   : > { %1390 = vmatprep.subr.mxu1 %v703_v23 }
  0x2d   : > { %1391 = vmatpush3.msra.mxu1 %v703_v23 }
  0x2e   : > { %1335 = vmatmul.mubr.msk.f32.gmra.mxu0 %vm344_vm0, %v310_v24  ;;  %1392 = vmatprep.subr.mxu1 %v702_v25 }
  0x2f   : > { %1337 = vmatprep.mubr.msk.f32.mxu0 %vm344_vm0, %v311_v26  ;;  %1393 = vmatpush3.msra.mxu1 %v702_v25 }
  0x30   : > { %1394 = vmatprep.subr.mxu1 %v701_v48 }
  0x31   : > { %1395 = vmatpush3.msra.mxu1 %v701_v48 }
  0x32   : > { %1338 = vmatmul.mubr.msk.f32.gmra.mxu0 %vm344_vm0, %v312_v27  ;;  %1396 = vmatprep.subr.mxu1 %v700_v49 }
  0x33   : > { %1340 = vmatprep.mubr.msk.f32.mxu0 %vm344_vm0, %v313_v28  ;;  %1397 = vmatpush3.msra.mxu1 %v700_v49 }
  0x34   : > { %1398 = vmatprep.subr.mxu1 %v699_v50 }
  0x35   : > { %1399 = vmatpush3.msra.mxu1 %v699_v50 }
  0x36   : > { %1341 = vmatmul.mubr.msk.f32.gmra.mxu0 %vm344_vm0, %v314_v29  ;;  %1400 = vmatprep.subr.mxu1 %v698_v51 }
  0x37   : > { %1343 = vmatprep.mubr.msk.f32.mxu0 %vm344_vm0, %v315_v30  ;;  %1401 = vmatpush3.msra.mxu1 %v698_v51 }
  0x3a   : > { %1344 = vmatmul.mubr.msk.f32.gmra.mxu0 %vm344_vm0, %v316_v31 }
  0x3b   : > { %1346 = vmatprep.mubr.msk.f32.mxu0 %vm344_vm0, %v317_v32 }
  0x3e   : > { %1347 = vmatmul.mubr.msk.f32.gmra.mxu0 %vm344_vm0, %v318_v33 }
  0x3f   : > { %1349 = vmatprep.mubr.msk.f32.mxu0 %vm344_vm0, %v319_v34 }
  0x42   : > { %1350 = vmatmul.mubr.msk.f32.gmra.mxu0 %vm344_vm0, %v320_v35 }
  0x43   : > { %1352 = vmatprep.mubr.msk.f32.mxu0 %vm344_vm0, %v321_v36 }
  0x46   : > { %1353 = vmatmul.mubr.msk.f32.gmra.mxu0 %vm344_vm0, %v322_v37 }
  0x47   : > { %1355 = vmatprep.mubr.msk.f32.mxu0 %vm344_vm0, %v323_v38 }
  0x4a   : > { %1356 = vmatmul.mubr.msk.f32.gmra.mxu0 %vm344_vm0, %v324_v39 }
  0x4b   : > { %1358 = vmatprep.mubr.msk.f32.mxu0 %vm344_vm0, %v325_v40 }
  0x4e   : > { %1359 = vmatmul.mubr.msk.f32.gmra.mxu0 %vm344_vm0, %v326_v41 }
  0x4f   : > { %1361 = vmatprep.mubr.msk.f32.mxu0 %vm344_vm0, %v327_v42 }
  0x52   : > { %1362 = vmatmul.mubr.msk.f32.gmra.mxu0 %vm344_vm0, %v328_v43 }
  0x53   : > { %1364 = vmatprep.mubr.msk.f32.mxu0 %vm344_vm0, %v329_v44 }
  0x56   : > { %1365 = vmatmul.mubr.msk.f32.gmra.mxu0 %vm344_vm0, %v330_v45 }
  0x57   : > { %1367 = vmatprep.mubr.msk.f32.mxu0 %vm344_vm0, %v331_v46 }
  0x5a   : > { %1368 = vmatmul.mubr.msk.f32.gmra.mxu0 %vm344_vm0, %v332_v47 }
  0xde   : > { %v1324_v53 = vpop.f32.mrf.mxu0 }
  0xdf   : > { %v513_v54 = vadd.f32 %v1324_v53, %v1778_v52 }
  0xe0   : > { %v507_v55 = vpop.f32.mrf.mxu0 }
  0xe1   : > { %v508_v56 = vadd.f32 %v1778_v52, %v507_v55  ;;  %v667_v59 = vmax.f32 %v513_v54, 0.0 }
  0xe2   : > { %v1327_v57 = vpop.f32.mrf.mxu0 }
  0xe3   : > { %v666_v58 = vmax.f32 %v508_v56, 0.0  ;;  %v523_v60 = vadd.f32 %v1327_v57, %v1778_v52 }
  0xe4   : > { %v517_v61 = vpop.f32.mrf.mxu0 }
  0xe5   : > { %v518_v62 = vadd.f32 %v1778_v52, %v517_v61  ;;  %1402 = vmatprep.mubr.f32.mxu1 %v666_v58  ;;  %v669_v1 = vmax.f32 %v523_v60, 0.0 }
  0xe6   : > { %v1330_v63 = vpop.f32.mrf.mxu0  ;;  %1403 = vmatmul.mubr.f32.vlgmr.msra.gmra.mxu1 %v667_v59 }
  0xe7   : > { %v668_v0 = vmax.f32 %v518_v62, 0.0  ;;  %v533_v2 = vadd.f32 %v1330_v63, %v1778_v52 }
  0xe8   : > { %v527_v3 = vpop.f32.mrf.mxu0 }
  0xe9   : > { %v528_v4 = vadd.f32 %v1778_v52, %v527_v3  ;;  %1405 = vmatprep.mubr.f32.mxu1 %v668_v0  ;;  %v671_v7 = vmax.f32 %v533_v2, 0.0 }
  0xea   : > { %v1333_v5 = vpop.f32.mrf.mxu0  ;;  %1406 = vmatmul.mubr.f32.gmra.mxu1 %v669_v1 }
  0xeb   : > { %v670_v6 = vmax.f32 %v528_v4, 0.0  ;;  %v543_v8 = vadd.f32 %v1333_v5, %v1778_v52 }
  0xec   : > { %v537_v9 = vpop.f32.mrf.mxu0 }
  0xed   : > { %v538_v10 = vadd.f32 %v1778_v52, %v537_v9  ;;  %1408 = vmatprep.mubr.f32.mxu1 %v670_v6  ;;  %v673_v13 = vmax.f32 %v543_v8, 0.0 }
  0xee   : > { %v1336_v11 = vpop.f32.mrf.mxu0  ;;  %1409 = vmatmul.mubr.f32.gmra.mxu1 %v671_v7 }
  0xef   : > { %v672_v12 = vmax.f32 %v538_v10, 0.0  ;;  %v553_v14 = vadd.f32 %v1336_v11, %v1778_v52 }
  0xf0   : > { %v547_v15 = vpop.f32.mrf.mxu0 }
  0xf1   : > { %v548_v16 = vadd.f32 %v1778_v52, %v547_v15  ;;  %1411 = vmatprep.mubr.f32.mxu1 %v672_v12  ;;  %v675_v19 = vmax.f32 %v553_v14, 0.0 }
  0xf2   : > { %v1339_v17 = vpop.f32.mrf.mxu0  ;;  %1412 = vmatmul.mubr.f32.gmra.mxu1 %v673_v13 }
  0xf3   : > { %v674_v18 = vmax.f32 %v548_v16, 0.0  ;;  %v563_v20 = vadd.f32 %v1339_v17, %v1778_v52 }
  0xf4   : > { %v557_v21 = vpop.f32.mrf.mxu0 }
  0xf5   : > { %v558_v22 = vadd.f32 %v1778_v52, %v557_v21  ;;  %1414 = vmatprep.mubr.f32.mxu1 %v674_v18  ;;  %v677_v25 = vmax.f32 %v563_v20, 0.0 }
  0xf6   : > { %v1342_v23 = vpop.f32.mrf.mxu0  ;;  %1415 = vmatmul.mubr.f32.gmra.mxu1 %v675_v19 }
  0xf7   : > { %v676_v24 = vmax.f32 %v558_v22, 0.0  ;;  %v573_v26 = vadd.f32 %v1342_v23, %v1778_v52  ;;  %v1815_v22 = vld [vmem:[%s1940_s5] sm:$0x1] }
  0xf8   : > { %v567_v27 = vpop.f32.mrf.mxu0  ;;  %1312 = vmatprep.mubr.f32.mxu0 %v1815_v22 }
  0xf9   : > { %v568_v28 = vadd.f32 %v1778_v52, %v567_v27  ;;  %1417 = vmatprep.mubr.f32.mxu1 %v676_v24  ;;  %v679_v31 = vmax.f32 %v573_v26, 0.0 }
  0xfa   : > { %v1345_v29 = vpop.f32.mrf.mxu0  ;;  %1418 = vmatmul.mubr.f32.gmra.mxu1 %v677_v25 }
  0xfb   : > { %v678_v30 = vmax.f32 %v568_v28, 0.0  ;;  %v583_v32 = vadd.f32 %v1345_v29, %v1778_v52 }
  0xfc   : > { %v577_v33 = vpop.f32.mrf.mxu0 }
  0xfd   : > { %v578_v34 = vadd.f32 %v1778_v52, %v577_v33  ;;  %1420 = vmatprep.mubr.f32.mxu1 %v678_v30  ;;  %v681_v37 = vmax.f32 %v583_v32, 0.0 }
  0xfe   : > { %v1348_v35 = vpop.f32.mrf.mxu0  ;;  %1421 = vmatmul.mubr.f32.gmra.mxu1 %v679_v31 }
  0xff   : > { %v680_v36 = vmax.f32 %v578_v34, 0.0  ;;  %v593_v38 = vadd.f32 %v1348_v35, %v1778_v52 }
 0x100   : > { %v587_v39 = vpop.f32.mrf.mxu0 }
 0x101   : > { %v588_v40 = vadd.f32 %v1778_v52, %v587_v39  ;;  %1423 = vmatprep.mubr.f32.mxu1 %v680_v36  ;;  %v683_v43 = vmax.f32 %v593_v38, 0.0 }
 0x102   : > { %v1351_v41 = vpop.f32.mrf.mxu0  ;;  %1424 = vmatmul.mubr.f32.gmra.mxu1 %v681_v37 }
 0x103   : > { %v682_v42 = vmax.f32 %v588_v40, 0.0  ;;  %v603_v44 = vadd.f32 %v1351_v41, %v1778_v52 }
 0x104   : > { %v597_v45 = vpop.f32.mrf.mxu0 }
 0x105   : > { %v598_v46 = vadd.f32 %v1778_v52, %v597_v45  ;;  %1426 = vmatprep.mubr.f32.mxu1 %v682_v42  ;;  %v685_v49 = vmax.f32 %v603_v44, 0.0 }
 0x106   : > { %v1354_v47 = vpop.f32.mrf.mxu0  ;;  %1427 = vmatmul.mubr.f32.gmra.mxu1 %v683_v43 }
 0x107   : > { %v684_v48 = vmax.f32 %v598_v46, 0.0  ;;  %v613_v50 = vadd.f32 %v1354_v47, %v1778_v52 }
 0x108   : > { %v607_v51 = vpop.f32.mrf.mxu0 }
 0x109   : > { %v608_v53 = vadd.f32 %v1778_v52, %v607_v51  ;;  %1429 = vmatprep.mubr.f32.mxu1 %v684_v48  ;;  %v687_v56 = vmax.f32 %v613_v50, 0.0 }
 0x10a   : > { %v1357_v54 = vpop.f32.mrf.mxu0  ;;  %1430 = vmatmul.mubr.f32.gmra.mxu1 %v685_v49 }
 0x10b   : > { %v686_v55 = vmax.f32 %v608_v53, 0.0  ;;  %v623_v57 = vadd.f32 %v1357_v54, %v1778_v52  ;;  %v1851_v53 = vld [vmem:[%s1939_s4] ss:$0 sm:$0xff] }
 0x10c   : > { %v617_v58 = vpop.f32.mrf.mxu0 }
 0x10d   : > { %v618_v59 = vadd.f32 %v1778_v52, %v617_v58  ;;  %1432 = vmatprep.mubr.f32.mxu1 %v686_v55  ;;  %v689_v62 = vmax.f32 %v623_v57, 0.0 }
 0x10e   : > { %v1360_v60 = vpop.f32.mrf.mxu0  ;;  %1433 = vmatmul.mubr.f32.gmra.mxu1 %v687_v56 }
 0x10f   : > { %v688_v61 = vmax.f32 %v618_v59, 0.0  ;;  %v633_v63 = vadd.f32 %v1360_v60, %v1778_v52 }
 0x110   : > { %v627_v0 = vpop.f32.mrf.mxu0 }
 0x111   : > { %v628_v1 = vadd.f32 %v1778_v52, %v627_v0  ;;  %1435 = vmatprep.mubr.f32.mxu1 %v688_v61  ;;  %v691_v4 = vmax.f32 %v633_v63, 0.0 }
 0x112   : > { %v1363_v2 = vpop.f32.mrf.mxu0  ;;  %1436 = vmatmul.mubr.f32.gmra.mxu1 %v689_v62 }
 0x113   : > { %v690_v3 = vmax.f32 %v628_v1, 0.0  ;;  %v643_v5 = vadd.f32 %v1363_v2, %v1778_v52 }
 0x114   : > { %v637_v6 = vpop.f32.mrf.mxu0 }
 0x115   : > { %v638_v7 = vadd.f32 %v1778_v52, %v637_v6  ;;  %1438 = vmatprep.mubr.f32.mxu1 %v690_v3  ;;  %v693_v10 = vmax.f32 %v643_v5, 0.0 }
 0x116   : > { %v1366_v8 = vpop.f32.mrf.mxu0  ;;  %1439 = vmatmul.mubr.f32.gmra.mxu1 %v691_v4 }
 0x117   : > { %v692_v9 = vmax.f32 %v638_v7, 0.0  ;;  %v653_v11 = vadd.f32 %v1366_v8, %v1778_v52 }
 0x118   : > { %v647_v12 = vpop.f32.mrf.mxu0 }
 0x119   : > { %v648_v13 = vadd.f32 %v1778_v52, %v647_v12  ;;  %1441 = vmatprep.mubr.f32.mxu1 %v692_v9  ;;  %v695_v16 = vmax.f32 %v653_v11, 0.0 }
 0x11a   : > { %v1369_v14 = vpop.f32.mrf.mxu0  ;;  %1442 = vmatmul.mubr.f32.gmra.mxu1 %v693_v10 }
 0x11b   : > { %v694_v15 = vmax.f32 %v648_v13, 0.0  ;;  %v663_v17 = vadd.f32 %v1369_v14, %v1778_v52 }
 0x11c   : > { %v657_v18 = vpop.f32.mrf.mxu0 }
 0x11d   : > { %v658_v19 = vadd.f32 %v1778_v52, %v657_v18  ;;  %1444 = vmatprep.mubr.f32.mxu1 %v694_v15  ;;  %v697_v21 = vmax.f32 %v663_v17, 0.0 }
 0x11e   : > { %1445 = vmatmul.mubr.f32.gmra.mxu1 %v695_v16 }
 0x11f   : > { %v696_v20 = vmax.f32 %v658_v19, 0.0 }
 0x121   : > { %1447 = vmatprep.mubr.f32.mxu1 %v696_v20 }
 0x122   : > { %1448 = vmatmul.mubr.f32.gmra.mxu1 %v697_v21 }
 0x1a6   : > { %v1818_v23 = vpop.f32.mrf.mxu1 }
 0x1a8   : > { %v1820_v24 = vpop.f32.mrf.mxu1 }
 0x1aa   : > { %v1822_v25 = vpop.f32.mrf.mxu1 }
 0x1ac   : > { %v1824_v52 = vpop.f32.mrf.mxu1 }
 0x1ae   : > { %v1826_v26 = vpop.f32.mrf.mxu1 }
 0x1b0   : > { %v1828_v27 = vpop.f32.mrf.mxu1 }
 0x1b2   : > { %v1830_v28 = vpop.f32.mrf.mxu1 }
 0x1b4   : > { %v1832_v29 = vpop.f32.mrf.mxu1 }
 0x1b6   : > { %v1416_v30 = vpop.f32.mrf.mxu1 }
 0x1b7   : > { %v833_v16 = vadd.f32 %v1416_v30, %v1851_v53 }
 0x1b8   : > { %v1834_v31 = vpop.f32.mrf.mxu1 }
 0x1b9   : > { %v955_v20 = vmax.f32 %v833_v16, 0.0  ;;  %v828_v21 = vadd.f32 %v1851_v53, %v1834_v31 }
 0x1ba   : > { %v1419_v32 = vpop.f32.mrf.mxu1 }
 0x1bb   : > { %v843_v8 = vadd.f32 %v1419_v32, %v1851_v53 }
 0x1bc   : > { %v837_v33 = vpop.f32.mrf.mxu1 }
 0x1bd   : > { %v957_v12 = vmax.f32 %v843_v8, 0.0  ;;  %v838_v13 = vadd.f32 %v1851_v53, %v837_v33 }
 0x1be   : > { %v1422_v34 = vpop.f32.mrf.mxu1 }
 0x1bf   : > { %v853_v0 = vadd.f32 %v1422_v34, %v1851_v53  ;;  %v956_v17 = vmax.f32 %v838_v13, 0.0  ;;  %v823_v34 = vadd.f32 %v1830_v28, %v1851_v53 }
 0x1c0   : > { %v847_v35 = vpop.f32.mrf.mxu1 }
 0x1c1   : > { %v959_v4 = vmax.f32 %v853_v0, 0.0  ;;  %v848_v5 = vadd.f32 %v1851_v53, %v847_v35  ;;  %v954_v35 = vmax.f32 %v828_v21, 0.0  ;;  %v980_v0 = vstv %s979_s22 }
 0x1c2   : > { %v1425_v36 = vpop.f32.mrf.mxu1 }
 0x1c3   : > { %v863_v54 = vadd.f32 %v1425_v36, %v1851_v53  ;;  %v958_v9 = vmax.f32 %v848_v5, 0.0 }
 0x1c4   : > { %v857_v37 = vpop.f32.mrf.mxu1 }
 0x1c5   : > { %v961_v60 = vmax.f32 %v863_v54, 0.0  ;;  %v858_v61 = vadd.f32 %v1851_v53, %v857_v37  ;;  %v953_v37 = vmax.f32 %v823_v34, 0.0 }
 0x1c6   : > { %v1836_v38 = vpop.f32.mrf.mxu1 }
 0x1c7   : > { %v960_v1 = vmax.f32 %v858_v61, 0.0 }
 0x1c8   : > { %v1838_v39 = vpop.f32.mrf.mxu1 }
 0x1ca   : > { %v1840_v40 = vpop.f32.mrf.mxu1 }
 0x1cc   : > { %v1842_v41 = vpop.f32.mrf.mxu1 }
 0x1ce   : > { %v1844_v42 = vpop.f32.mrf.mxu1 }
 0x1cf   : > { %v893_v31 = vadd.f32 %v1844_v42, %v1851_v53  ;;  %v883_v42 = vadd.f32 %v1840_v40, %v1851_v53  ;;  %v873_v40 = vadd.f32 %v1836_v38, %v1851_v53 }
 0x1d0   : > { %v1846_v43 = vpop.f32.mrf.mxu1 }
 0x1d1   : > { %v965_v54 = vmax.f32 %v883_v42, 0.0 }
 0x1d2   : > { %v1437_v44 = vpop.f32.mrf.mxu1 }
 0x1d3   : > { %v903_v32 = vadd.f32 %v1437_v44, %v1851_v53 }
 0x1d4   : > { %v897_v45 = vpop.f32.mrf.mxu1 }
 0x1d5   : > { %v969_v30 = vmax.f32 %v903_v32, 0.0  ;;  %v898_v36 = vadd.f32 %v1851_v53, %v897_v45  ;;  %v888_v45 = vadd.f32 %v1851_v53, %v1846_v43  ;;  %v878_v43 = vadd.f32 %v1851_v53, %v1842_v41 }
 0x1d6   : > { %v1440_v46 = vpop.f32.mrf.mxu1  ;;  %v868_v41 = vadd.f32 %v1851_v53, %v1838_v39 }
 0x1d7   : > { %v913_v14 = vadd.f32 %v1440_v46, %v1851_v53  ;;  %v818_v46 = vadd.f32 %v1851_v53, %v1832_v29  ;;  %v968_v44 = vmax.f32 %v898_v36, 0.0  ;;  %v808_v29 = vadd.f32 %v1851_v53, %v1828_v27 }
 0x1d8   : > { %v907_v47 = vpop.f32.mrf.mxu1  ;;  %v798_v27 = vadd.f32 %v1851_v53, %v1824_v52  ;;  %v788_v52 = vadd.f32 %v1851_v53, %v1820_v24 }
 0x1d9   : > { %v971_v18 = vmax.f32 %v913_v14, 0.0  ;;  %v908_v19 = vadd.f32 %v1851_v53, %v907_v47  ;;  %v813_v47 = vadd.f32 %v1826_v26, %v1851_v53  ;;  %v952_v28 = vmax.f32 %v818_v46, 0.0 }
 0x1da   : > { %v1443_v48 = vpop.f32.mrf.mxu1  ;;  %v803_v26 = vadd.f32 %v1822_v25, %v1851_v53  ;;  %v793_v25 = vadd.f32 %v1818_v23, %v1851_v53  ;;  %v946_v38 = vmax.f32 %v788_v52, 0.0  ;;  %v1552_v23 = vmov 1966171168  }
 0x1db   : > { %v923_v6 = vadd.f32 %v1443_v48, %v1851_v53  ;;  %v970_v33 = vmax.f32 %v908_v19, 0.0  ;;  %v967_v48 = vmax.f32 %v893_v31, 0.0  ;;  %v1056_v61 = vunpack.c.l.s4 %v1552_v23 }
 0x1dc   : > { %v917_v49 = vpop.f32.mrf.mxu1 }
 0x1dd   : > { %v973_v10 = vmax.f32 %v923_v6, 0.0  ;;  %v918_v11 = vadd.f32 %v1851_v53, %v917_v49  ;;  %v951_v49 = vmax.f32 %v813_v47, 0.0  ;;  %v1057_v39 = vunpack.c.0.s8 %v1056_v61 }
 0x1de   : > { %v1446_v50 = vpop.f32.mrf.mxu1 }
 0x1df   : > { %v933_v62 = vadd.f32 %v1446_v50, %v1851_v53  ;;  %v972_v15 = vmax.f32 %v918_v11, 0.0  ;;  %v966_v50 = vmax.f32 %v888_v45, 0.0 }
 0x1e0   : > { %v927_v51 = vpop.f32.mrf.mxu1 }
 0x1e1   : > { %v975_v2 = vmax.f32 %v933_v62, 0.0  ;;  %v928_v3 = vadd.f32 %v1851_v53, %v927_v51  ;;  %v950_v51 = vmax.f32 %v808_v29, 0.0  ;;  %v1058_v62 = vlaneseq }
 0x1e2   : > { %v1449_v55 = vpop.f32.mrf.mxu1 }
 0x1e3   : > { %v943_v56 = vadd.f32 %v1449_v55, %v1851_v53  ;;  %v974_v7 = vmax.f32 %v928_v3, 0.0  ;;  %v949_v55 = vmax.f32 %v803_v26, 0.0  ;;  %vm1072_vm1 = vcmp.lt.s32.totalorder %v1058_v62, 256 }
 0x1e4   : > { %v937_v57 = vpop.f32.mrf.mxu1 }
 0x1e5   : > { %v977_v58 = vmax.f32 %v943_v56, 0.0  ;;  %v938_v59 = vadd.f32 %v1851_v53, %v937_v57  ;;  %v964_v56 = vmax.f32 %v878_v43, 0.0  ;;  %v948_v57 = vmax.f32 %v798_v27, 0.0 }
 0x1e7   : > { %v976_v63 = vmax.f32 %v938_v59, 0.0  ;;  %1280 = vmatprep.subr.mxu0 %v977_v58  ;;  %v963_v58 = vmax.f32 %v873_v40, 0.0  ;;  %v947_v59 = vmax.f32 %v793_v25, 0.0 }
 0x1e8   : > { %1281 = vmatpush3.xpose.msra.mxu0 %v961_v60  ;;  %v962_v60 = vmax.f32 %v868_v41, 0.0 }
 0x1e9   : > { %1282 = vmatprep.subr.mxu0 %v976_v63  ;;  %v1059_v63 = vshrl.u32 %v1058_v62, 7 }
 0x1eb   : > { %v1060_v3 = vsub.s32 %v1057_v39, %v1059_v63 }
 0x1ec   : > { %1283 = vmatpush3.xpose.msra.mxu0 %v960_v1 }
 0x1ed   : > { %1284 = vmatprep.subr.mxu0 %v975_v2 }
 0x1f0   : > { %1285 = vmatpush3.xpose.msra.mxu0 %v959_v4 }
 0x1f1   : > { %1286 = vmatprep.subr.mxu0 %v974_v7 }
 0x1f4   : > { %1287 = vmatpush3.xpose.msra.mxu0 %v958_v9 }
 0x1f5   : > { %1288 = vmatprep.subr.mxu0 %v973_v10 }
 0x1f8   : > { %1289 = vmatpush3.xpose.msra.mxu0 %v957_v12 }
 0x1f9   : > { %1290 = vmatprep.subr.mxu0 %v972_v15 }
 0x1fc   : > { %1291 = vmatpush3.xpose.msra.mxu0 %v956_v17 }
 0x1fd   : > { %1292 = vmatprep.subr.mxu0 %v971_v18 }
 0x200   : > { %1293 = vmatpush3.xpose.msra.mxu0 %v955_v20 }
 0x201   : > { %1294 = vmatprep.subr.mxu0 %v970_v33 }
 0x204   : > { %1295 = vmatpush3.xpose.msra.mxu0 %v954_v35 }
 0x205   : > { %1296 = vmatprep.subr.mxu0 %v969_v30 }
 0x208   : > { %1297 = vmatpush3.xpose.msra.mxu0 %v953_v37 }
 0x209   : > { %1298 = vmatprep.subr.mxu0 %v968_v44 }
 0x20c   : > { %1299 = vmatpush3.xpose.msra.mxu0 %v952_v28 }
 0x20d   : > { %1300 = vmatprep.subr.mxu0 %v967_v48 }
 0x210   : > { %1301 = vmatpush3.xpose.msra.mxu0 %v951_v49 }
 0x211   : > { %1302 = vmatprep.subr.mxu0 %v966_v50 }
 0x214   : > { %1303 = vmatpush3.xpose.msra.mxu0 %v950_v51 }
 0x215   : > { %1304 = vmatprep.subr.mxu0 %v965_v54 }
 0x218   : > { %1305 = vmatpush3.xpose.msra.mxu0 %v949_v55 }
 0x219   : > { %1306 = vmatprep.subr.mxu0 %v964_v56 }
 0x21c   : > { %1307 = vmatpush3.xpose.msra.mxu0 %v948_v57 }
 0x21d   : > { %1308 = vmatprep.subr.mxu0 %v963_v58 }
 0x220   : > { %1309 = vmatpush3.xpose.msra.mxu0 %v947_v59 }
 0x221   : > { %1310 = vmatprep.subr.mxu0 %v962_v60 }
 0x224   : > { %1311 = vmatpush3.xpose.msra.mxu0 %v946_v38 }
 0x227   : > { %1313 = vmatmul.mubr.f32.vlgmr.msra.gmra.mxu0 %v1815_v22 }
 0x2e7   : > { %v1047_v1 = vpop.f32.mrf.mxu0 }
 0x2e8   : > { %v1048_v24 = vadd.f32 %v1047_v1, %v980_v0 }
 0x2e9   : > { %v1049_v2 = vpop.f32.mrf.mxu0 }
 0x2ea   : > { %v1050_v53 = vadd.f32 %v1049_v2, %v980_v0 }
 0x2ec   : > { %v1054_v4 = vcombine.low %v1048_v24, %v1050_v53 }
 0x2ee   : > { %v1061_v22 = vrot.slane %v1054_v4, %v1060_v3 }
 0x2f0   : > { %v1068_v5 = vrot.slane %v1061_v22, %v1060_v3 }
 0x2f2   : > { %1074 = vst.msk [vmem:[%s285_s25] sm:$0x3] %vm1072_vm1, %v1068_v5 }
 0x2f3   : > { %1503 = shalt.err (!%p1500_p3)
}
 0x2f4   : > { %s1504_s20 = scalar_lea.hbm %s1088_s17, 32  ;;  %s1508_s22 = scalar_lea.hbm %s1942_s7, 64 }
 0x2f5   : > { %p1505_p4 = scmp.ne.s32.totalorder %s1088_s17, %s1504_s20  ;;  %p1509_p9 = scmp.lt.s32.totalorder %s1088_s17, %s1942_s7 }
 0x2f6   : > { %p1510_p10 = scmp.lt.s32.totalorder %s1508_s22, %s1504_s20 }
 0x2f7   : > { %p1506_p7 = pnand %p1505_p4, %p1632_p5 }
 0x2f8   : > { %p1511_p11 = por %p1510_p10, %p1509_p9 }
 0x2f9   : > { %p1507_p8 = pneg %p1506_p7 }
 0x2fb   : > { %p1512_p12 = pnand %p1511_p11, %p1507_p8 }
 0x2fd   : > { %1515 = shalt.err (!%p1512_p12)
}
 0x2fe   : > { %1450 = dma.vmem_to_hbm [thread:$0]  (%p1632_p5), %s1091_s6, 32, %s1088_s17, %s1076_s10  }
 0x2ff PF: > { %p1456_p13 = scmp.ge.s32.totalorder %s1550_s29, 2  ;;  %s1102_s25 = sand.u32 1, %s1538_s26  }
 0x300   : > { %s1103_s30 = scalar_lea.sflag [#allocation4], %s1102_s25 }
 0x301   : > { %p1453_p0 = pnand %p1456_p13, %p1636_p6 }
 0x303   : > { %p1454_p1 = pneg %p1453_p0 }
 0x305   : > { %1533 = dma.done.wait (%p1454_p1), %s1103_s30, 32  }
 0x306   : > { %1535 = vsyncadd (%p1454_p1), %s1103_s30, 4294967264  ;;  %p18_p2 = scmp.ge.s32.totalorder %s1620_s8, 4   ;;  %s1945_s26 = smov %s1542_s27 }
 0x307   : > { %s1946_s27 = smov %s1546_s28  ;;  %s1947_s28 = smov %s1630_s11 }
 0x308   : > { %s1948_s29 = smov %s1620_s8  ;;  %20 = sbr.rel (!%p18_p2) target bundleno = 5 (0x5), region = 83 }
 0x30d   :  { %1108 = vsyncpa [#allocation4], 1 }
 0x30e   :  { %1110 = vsyncpa [#allocation4 + $0x1], 1 }

</bundles_post_ra>
